<compile_context>
chip_gen: v5e
topology: v5e:2x2
jax: 0.10.0
libtpu: 0.0.40
codegen_flags: <defaults>
</compile_context>

<pallas_src>
import functools

import jax
import jax.numpy as jnp
from jax.experimental import pallas as pl
from jax.experimental.pallas import tpu as pltpu

LANE = 128


def _round_up(n, m):
    return ((n + m - 1) // m) * m


def _pad_to(a, shape):
    out = jnp.zeros(shape, a.dtype)
    return out.at[tuple(slice(0, s) for s in a.shape)].set(a)


def deepvib_kernel(x_ref, w1_ref, b1_ref, w2_ref, b2_ref,
                   whead_ref, bhead_ref, wdec_ref, bdec_ref, eps_ref,
                   out_ref, musdt_ref, *, z_dim):
    # encoder: Linear -> ReLU -> Linear -> ReLU  (bf16 operands, f32 accumulate)
    h = jnp.dot(x_ref[...], w1_ref[...],
                preferred_element_type=jnp.float32) + b1_ref[...]
    h = jnp.maximum(h, 0.0)
    h = jnp.dot(h.astype(jnp.bfloat16), w2_ref[...],
                preferred_element_type=jnp.float32) + b2_ref[...]
    h = jnp.maximum(h, 0.0)

    # fused mu/std head: cols [0:z) = mu, [z:2z) = pre-softplus std, rest zero-padded
    head = jnp.dot(h.astype(jnp.bfloat16), whead_ref[...],
                   preferred_element_type=jnp.float32) + bhead_ref[...]

    col = jax.lax.broadcasted_iota(jnp.int32, head.shape, 1)
    is_mu = col < z_dim
    is_std = (col >= z_dim) & (col < 2 * z_dim)

    # stable softplus(t) = max(t,0) + log1p(exp(-|t|)), applied only on the std lanes
    t = head - 5.0
    sp = jnp.maximum(t, 0.0) + jnp.log1p(jnp.exp(-jnp.abs(t)))
    musdt = jnp.where(is_std, sp, head)
    musdt_ref[...] = musdt  # lane-dense (TB, 128) store; mu|std sliced in wrapper

    # reparameterise + decode without cross-lane shifts:
    #   zfull cols [0:z) = mu, [z:2z) = std*eps, and the decoder weight has wdec
    #   duplicated in row blocks [0:z) and [z:2z), so zfull @ wdec == (mu+std*eps) @ wdec
    zfull = jnp.where(is_mu, musdt,
                      jnp.where(is_std, musdt * eps_ref[...], 0.0))
    out_ref[...] = jnp.dot(zfull.astype(jnp.bfloat16), wdec_ref[...],
                           preferred_element_type=jnp.float32) + bdec_ref[...]


def deepvib_forward(x_flat, params, eps, *, block_b=256):
    """x_flat: (B, input_shape) f32; eps: (B, z_dim) f32. Returns (out, mu, std)."""
    B, in_dim = x_flat.shape
    inter = params["w1"].shape[1]
    z_dim = params["wmu"].shape[1]
    out_dim = params["wdec"].shape[1]
    assert inter <= LANE and 2 * z_dim <= LANE and out_dim <= LANE

    in_p = _round_up(in_dim, LANE)
    # Batch tile: >=8 (sublane), 256 for throughput. Keep TB * in_p * 2B * 2 bufs
    # small vs. v7x's 32 MiB scoped VMEM default.
    tb = block_b if B >= block_b else _round_up(max(B, 8), 8)
    b_pad = _round_up(B, tb)

    # --- padded, lane-dense, bf16 matmul operands -------------------------------
    w1p = _pad_to(params["w1"], (in_p, LANE)).astype(jnp.bfloat16)
    w2p = _pad_to(params["w2"], (LANE, LANE)).astype(jnp.bfloat16)

    wheadp = jnp.zeros((LANE, LANE), jnp.float32)
    wheadp = wheadp.at[:inter, :z_dim].set(params["wmu"])
    wheadp = wheadp.at[:inter, z_dim:2 * z_dim].set(params["wstd"])
    wheadp = wheadp.astype(jnp.bfloat16)

    wdecp = jnp.zeros((LANE, LANE), jnp.float32)
    wdecp = wdecp.at[:z_dim, :out_dim].set(params["wdec"])
    wdecp = wdecp.at[z_dim:2 * z_dim, :out_dim].set(params["wdec"])
    wdecp = wdecp.astype(jnp.bfloat16)

    b1p = _pad_to(params["b1"], (1, LANE))
    b2p = _pad_to(params["b2"], (1, LANE))
    bheadp = jnp.zeros((1, LANE), jnp.float32)
    bheadp = bheadp.at[:, :z_dim].set(params["bmu"])
    bheadp = bheadp.at[:, z_dim:2 * z_dim].set(params["bstd"])
    bdecp = _pad_to(params["bdec"], (1, LANE))

    xp = _pad_to(x_flat, (b_pad, in_p)).astype(jnp.bfloat16)
    epsp = jnp.zeros((b_pad, LANE), jnp.float32).at[:B, z_dim:2 * z_dim].set(eps)

    kern = functools.partial(deepvib_kernel, z_dim=z_dim)

    grid_spec = pltpu.PrefetchScalarGridSpec(
        num_scalar_prefetch=0,
        grid=(b_pad // tb,),
        in_specs=[
            pl.BlockSpec((tb, in_p), lambda i: (i, 0)),      # x tile
            pl.BlockSpec((in_p, LANE), lambda i: (0, 0)),    # w1 (resident)
            pl.BlockSpec((1, LANE), lambda i: (0, 0)),       # b1
            pl.BlockSpec((LANE, LANE), lambda i: (0, 0)),    # w2
            pl.BlockSpec((1, LANE), lambda i: (0, 0)),       # b2
            pl.BlockSpec((LANE, LANE), lambda i: (0, 0)),    # fused mu|std head W
            pl.BlockSpec((1, LANE), lambda i: (0, 0)),       # fused head bias
            pl.BlockSpec((LANE, LANE), lambda i: (0, 0)),    # duplicated decoder W
            pl.BlockSpec((1, LANE), lambda i: (0, 0)),       # decoder bias
            pl.BlockSpec((tb, LANE), lambda i: (i, 0)),      # eps tile
        ],
        out_specs=[
            pl.BlockSpec((tb, LANE), lambda i: (i, 0)),      # decoder out (padded)
            pl.BlockSpec((tb, LANE), lambda i: (i, 0)),      # mu|std (padded)
        ],
    )

    out_pad, musdt_pad = pl.pallas_call(
        kern,
        out_shape=(jax.ShapeDtypeStruct((b_pad, LANE), jnp.float32),
                   jax.ShapeDtypeStruct((b_pad, LANE), jnp.float32)),
        grid_spec=grid_spec,
        compiler_params=pltpu.CompilerParams(
            dimension_semantics=("parallel",)),
    )(xp, w1p, b1p, w2p, b2p, wheadp, bheadp, wdecp, bdecp, epsp)

    out = out_pad[:B, :out_dim]
    mu = musdt_pad[:B, :z_dim]
    std = musdt_pad[:B, z_dim:2 * z_dim]
    return out, mu, std


def init_params(key, input_shape, output_shape, z_dim, intermediate=64):
    """PyTorch-style Linear init; weights stored as (in, out) == torch weight.T."""
    def linear(k, fan_in, fan_out):
        kw, kb = jax.random.split(k)
        bound = 1.0 / jnp.sqrt(float(fan_in))
        w = jax.random.uniform(kw, (fan_in, fan_out), jnp.float32, -bound, bound)
        b = jax.random.uniform(kb, (1, fan_out), jnp.float32, -bound, bound)
        return w, b

    k1, k2, k3, k4, k5 = jax.random.split(key, 5)
    w1, b1 = linear(k1, input_shape, intermediate)
    w2, b2 = linear(k2, intermediate, intermediate)
    wmu, bmu = linear(k3, intermediate, z_dim)
    wstd, bstd = linear(k4, intermediate, z_dim)
    wdec, bdec = linear(k5, z_dim, output_shape)
    return dict(w1=w1, b1=b1, w2=w2, b2=b2,
                wmu=wmu, bmu=bmu, wstd=wstd, bstd=bstd,
                wdec=wdec, bdec=bdec)


def ref_forward(x_flat, params, eps):
    """Plain-JAX reference mirroring the kernel's bf16-operand / f32-accumulate dots."""
    c = lambda a: a.astype(jnp.bfloat16).astype(jnp.float32)
    h = jnp.maximum(c(x_flat) @ c(params["w1"]) + params["b1"], 0.0)
    h = jnp.maximum(c(h) @ c(params["w2"]) + params["b2"], 0.0)
    mu = c(h) @ c(params["wmu"]) + params["bmu"]
    t = c(h) @ c(params["wstd"]) + params["bstd"] - 5.0
    std = jax.nn.softplus(t)
    z = mu + std * eps
    out = c(z) @ c(params["wdec"]) + params["bdec"]
    return out, mu, std


if __name__ == "__main__":
    # Example: x is NCHW (2, 4, 16, 16) -> flattened input_shape = 1024
    B, C, H, W = 2, 4, 16, 16
    input_shape = C * H * W
    z_dim = 32
    output_shape = 16

    key = jax.random.PRNGKey(0)
    kx, keps, kparams = jax.random.split(key, 3)

    x = jax.random.normal(kx, (B, C, H, W), jnp.float32)
    x_flat = x.reshape(B, -1)                       # == x.view(x.size(0), -1)
    eps = jax.random.normal(keps, (B, z_dim), jnp.float32)
    params = init_params(kparams, input_shape, output_shape, z_dim)

    out, mu, std = deepvib_forward(x_flat, params, eps)
    jax.block_until_ready((out, mu, std))

    out_r, mu_r, std_r = ref_forward(x_flat, params, eps)
    assert jnp.allclose(mu, mu_r, rtol=2e-2, atol=2e-3), "mu mismatch"
    assert jnp.allclose(std, std_r, rtol=2e-2, atol=2e-3), "std mismatch"
    assert jnp.allclose(out, out_r, rtol=2e-2, atol=3e-3), "decoder output mismatch"

    print("KERNEL_OK")
</pallas_src>

<mosaic_0001>
module attributes {stable_mosaic.version = 11 : i64} {
  func.func @deepvib_kernel(%arg0: i32, %arg1: memref<8x1024xbf16, #tpu.memory_space<vmem>>, %arg2: memref<1024x128xbf16, #tpu.memory_space<vmem>>, %arg3: memref<1x128xf32, #tpu.memory_space<vmem>>, %arg4: memref<128x128xbf16, #tpu.memory_space<vmem>>, %arg5: memref<1x128xf32, #tpu.memory_space<vmem>>, %arg6: memref<128x128xbf16, #tpu.memory_space<vmem>>, %arg7: memref<1x128xf32, #tpu.memory_space<vmem>>, %arg8: memref<128x128xbf16, #tpu.memory_space<vmem>>, %arg9: memref<1x128xf32, #tpu.memory_space<vmem>>, %arg10: memref<8x128xf32, #tpu.memory_space<vmem>>, %arg11: memref<8x128xf32, #tpu.memory_space<vmem>>, %arg12: memref<8x128xf32, #tpu.memory_space<vmem>>) attributes {dimension_semantics = [#tpu.dimension_semantics<parallel>], iteration_bounds = array<i64: 1>, scalar_prefetch = 0 : i64, scratch_operands = 0 : i64, tpu.core_type = #tpu.core_type<tc>, window_params = [{transform_indices = @transform_0, window_bounds = array<i64: 8, 1024>}, {pipeline_mode = #tpu.pipeline_mode<synchronous>, transform_indices = @transform_1, window_bounds = array<i64: 1024, 128>}, {pipeline_mode = #tpu.pipeline_mode<synchronous>, transform_indices = @transform_2, window_bounds = array<i64: 1, 128>}, {pipeline_mode = #tpu.pipeline_mode<synchronous>, transform_indices = @transform_3, window_bounds = array<i64: 128, 128>}, {pipeline_mode = #tpu.pipeline_mode<synchronous>, transform_indices = @transform_4, window_bounds = array<i64: 1, 128>}, {pipeline_mode = #tpu.pipeline_mode<synchronous>, transform_indices = @transform_5, window_bounds = array<i64: 128, 128>}, {pipeline_mode = #tpu.pipeline_mode<synchronous>, transform_indices = @transform_6, window_bounds = array<i64: 1, 128>}, {pipeline_mode = #tpu.pipeline_mode<synchronous>, transform_indices = @transform_7, window_bounds = array<i64: 128, 128>}, {pipeline_mode = #tpu.pipeline_mode<synchronous>, transform_indices = @transform_8, window_bounds = array<i64: 1, 128>}, {transform_indices = @transform_9, window_bounds = array<i64: 8, 128>}, {transform_indices = @transform_10, window_bounds = array<i64: 8, 128>}, {transform_indices = @transform_11, window_bounds = array<i64: 8, 128>}]} {
    %c0 = arith.constant 0 : index
    %c0_0 = arith.constant 0 : index
    %0 = vector.load %arg1[%c0, %c0_0] : memref<8x1024xbf16, #tpu.memory_space<vmem>>, vector<8x1024xbf16>
    %c0_1 = arith.constant 0 : index
    %c0_2 = arith.constant 0 : index
    %1 = vector.load %arg2[%c0_1, %c0_2] : memref<1024x128xbf16, #tpu.memory_space<vmem>>, vector<1024x128xbf16>
    %cst = arith.constant dense<0.000000e+00> : vector<8x128xf32>
    %2 = tpu.matmul %0, %1, %cst {dimension_numbers = #tpu.dot_dimension_numbers<[1], [0], [0], [1], [0, 0, 1, 1], [], []>} : vector<8x1024xbf16>, vector<1024x128xbf16>, vector<8x128xf32> -> vector<8x128xf32>
    %c0_3 = arith.constant 0 : index
    %c0_4 = arith.constant 0 : index
    %3 = vector.load %arg3[%c0_3, %c0_4] : memref<1x128xf32, #tpu.memory_space<vmem>>, vector<1x128xf32>
    %4 = vector.broadcast %3 : vector<1x128xf32> to vector<8x128xf32>
    %5 = arith.addf %2, %4 : vector<8x128xf32>
    %cst_5 = arith.constant 0.000000e+00 : f32
    %6 = vector.broadcast %cst_5 : f32 to vector<8x128xf32>
    %7 = arith.maximumf %5, %6 : vector<8x128xf32>
    %8 = arith.truncf %7 : vector<8x128xf32> to vector<8x128xbf16>
    %c0_6 = arith.constant 0 : index
    %c0_7 = arith.constant 0 : index
    %9 = vector.load %arg4[%c0_6, %c0_7] : memref<128x128xbf16, #tpu.memory_space<vmem>>, vector<128x128xbf16>
    %cst_8 = arith.constant dense<0.000000e+00> : vector<8x128xf32>
    %10 = tpu.matmul %8, %9, %cst_8 {dimension_numbers = #tpu.dot_dimension_numbers<[1], [0], [0], [1], [0, 0, 1, 1], [], []>} : vector<8x128xbf16>, vector<128x128xbf16>, vector<8x128xf32> -> vector<8x128xf32>
    %c0_9 = arith.constant 0 : index
    %c0_10 = arith.constant 0 : index
    %11 = vector.load %arg5[%c0_9, %c0_10] : memref<1x128xf32, #tpu.memory_space<vmem>>, vector<1x128xf32>
    %12 = vector.broadcast %11 : vector<1x128xf32> to vector<8x128xf32>
    %13 = arith.addf %10, %12 : vector<8x128xf32>
    %cst_11 = arith.constant 0.000000e+00 : f32
    %14 = vector.broadcast %cst_11 : f32 to vector<8x128xf32>
    %15 = arith.maximumf %13, %14 : vector<8x128xf32>
    %16 = arith.truncf %15 : vector<8x128xf32> to vector<8x128xbf16>
    %c0_12 = arith.constant 0 : index
    %c0_13 = arith.constant 0 : index
    %17 = vector.load %arg6[%c0_12, %c0_13] : memref<128x128xbf16, #tpu.memory_space<vmem>>, vector<128x128xbf16>
    %cst_14 = arith.constant dense<0.000000e+00> : vector<8x128xf32>
    %18 = tpu.matmul %16, %17, %cst_14 {dimension_numbers = #tpu.dot_dimension_numbers<[1], [0], [0], [1], [0, 0, 1, 1], [], []>} : vector<8x128xbf16>, vector<128x128xbf16>, vector<8x128xf32> -> vector<8x128xf32>
    %c0_15 = arith.constant 0 : index
    %c0_16 = arith.constant 0 : index
    %19 = vector.load %arg7[%c0_15, %c0_16] : memref<1x128xf32, #tpu.memory_space<vmem>>, vector<1x128xf32>
    %20 = vector.broadcast %19 : vector<1x128xf32> to vector<8x128xf32>
    %21 = arith.addf %18, %20 : vector<8x128xf32>
    %22 = tpu.iota {dimensions = array<i32: 1>} : vector<8x128xi32>
    %c32_i32 = arith.constant 32 : i32
    %23 = vector.broadcast %c32_i32 : i32 to vector<8x128xi32>
    %24 = arith.cmpi slt, %22, %23 : vector<8x128xi32>
    %c32_i32_17 = arith.constant 32 : i32
    %25 = vector.broadcast %c32_i32_17 : i32 to vector<8x128xi32>
    %26 = arith.cmpi sge, %22, %25 : vector<8x128xi32>
    %c64_i32 = arith.constant 64 : i32
    %27 = vector.broadcast %c64_i32 : i32 to vector<8x128xi32>
    %28 = arith.cmpi slt, %22, %27 : vector<8x128xi32>
    %29 = arith.andi %26, %28 : vector<8x128xi1>
    %cst_18 = arith.constant 5.000000e+00 : f32
    %30 = vector.broadcast %cst_18 : f32 to vector<8x128xf32>
    %31 = arith.subf %21, %30 : vector<8x128xf32>
    %cst_19 = arith.constant 0.000000e+00 : f32
    %32 = vector.broadcast %cst_19 : f32 to vector<8x128xf32>
    %33 = arith.maximumf %31, %32 : vector<8x128xf32>
    %34 = math.absf %31 : vector<8x128xf32>
    %cst_20 = arith.constant 0.000000e+00 : f32
    %35 = vector.broadcast %cst_20 : f32 to vector<8x128xf32>
    %36 = arith.subf %35, %34 : vector<8x128xf32>
    %37 = math.exp %36 : vector<8x128xf32>
    %38 = math.log1p %37 : vector<8x128xf32>
    %39 = arith.addf %33, %38 : vector<8x128xf32>
    %40 = arith.select %29, %39, %21 : vector<8x128xi1>, vector<8x128xf32>
    %c0_21 = arith.constant 0 : index
    %c0_22 = arith.constant 0 : index
    %41 = vector.load %arg12[%c0_21, %c0_22] : memref<8x128xf32, #tpu.memory_space<vmem>>, vector<8x128xf32>
    tpu.vector_store %arg12[%c0_21, %c0_22], %40 {strides = array<i32>} : memref<8x128xf32, #tpu.memory_space<vmem>>, vector<8x128xf32>,
    %c0_23 = arith.constant 0 : index
    %c0_24 = arith.constant 0 : index
    %42 = vector.load %arg10[%c0_23, %c0_24] : memref<8x128xf32, #tpu.memory_space<vmem>>, vector<8x128xf32>
    %43 = arith.mulf %40, %42 : vector<8x128xf32>
    %cst_25 = arith.constant 0.000000e+00 : f32
    %44 = vector.broadcast %cst_25 : f32 to vector<8x128xf32>
    %45 = arith.select %29, %43, %44 : vector<8x128xi1>, vector<8x128xf32>
    %46 = arith.select %24, %40, %45 : vector<8x128xi1>, vector<8x128xf32>
    %47 = arith.truncf %46 : vector<8x128xf32> to vector<8x128xbf16>
    %c0_26 = arith.constant 0 : index
    %c0_27 = arith.constant 0 : index
    %48 = vector.load %arg8[%c0_26, %c0_27] : memref<128x128xbf16, #tpu.memory_space<vmem>>, vector<128x128xbf16>
    %cst_28 = arith.constant dense<0.000000e+00> : vector<8x128xf32>
    %49 = tpu.matmul %47, %48, %cst_28 {dimension_numbers = #tpu.dot_dimension_numbers<[1], [0], [0], [1], [0, 0, 1, 1], [], []>} : vector<8x128xbf16>, vector<128x128xbf16>, vector<8x128xf32> -> vector<8x128xf32>
    %c0_29 = arith.constant 0 : index
    %c0_30 = arith.constant 0 : index
    %50 = vector.load %arg9[%c0_29, %c0_30] : memref<1x128xf32, #tpu.memory_space<vmem>>, vector<1x128xf32>
    %51 = vector.broadcast %50 : vector<1x128xf32> to vector<8x128xf32>
    %52 = arith.addf %49, %51 : vector<8x128xf32>
    %c0_31 = arith.constant 0 : index
    %c0_32 = arith.constant 0 : index
    %53 = vector.load %arg11[%c0_31, %c0_32] : memref<8x128xf32, #tpu.memory_space<vmem>>, vector<8x128xf32>
    tpu.vector_store %arg11[%c0_31, %c0_32], %52 {strides = array<i32>} : memref<8x128xf32, #tpu.memory_space<vmem>>, vector<8x128xf32>,
    return
  }
  func.func @transform_0(%arg0: i32) -> (i32, i32) {
    %c0_i32 = arith.constant 0 : i32
    %c0_i32_0 = arith.constant 0 : i32
    return %arg0, %c0_i32 : i32, i32
  }
  func.func @transform_1(%arg0: i32) -> (i32, i32) {
    %c0_i32 = arith.constant 0 : i32
    %c0_i32_0 = arith.constant 0 : i32
    %c0_i32_1 = arith.constant 0 : i32
    return %c0_i32, %c0_i32_0 : i32, i32
  }
  func.func @transform_2(%arg0: i32) -> (i32, i32) {
    %c0_i32 = arith.constant 0 : i32
    %c0_i32_0 = arith.constant 0 : i32
    %c0_i32_1 = arith.constant 0 : i32
    return %c0_i32, %c0_i32_0 : i32, i32
  }
  func.func @transform_3(%arg0: i32) -> (i32, i32) {
    %c0_i32 = arith.constant 0 : i32
    %c0_i32_0 = arith.constant 0 : i32
    %c0_i32_1 = arith.constant 0 : i32
    return %c0_i32, %c0_i32_0 : i32, i32
  }
  func.func @transform_4(%arg0: i32) -> (i32, i32) {
    %c0_i32 = arith.constant 0 : i32
    %c0_i32_0 = arith.constant 0 : i32
    %c0_i32_1 = arith.constant 0 : i32
    return %c0_i32, %c0_i32_0 : i32, i32
  }
  func.func @transform_5(%arg0: i32) -> (i32, i32) {
    %c0_i32 = arith.constant 0 : i32
    %c0_i32_0 = arith.constant 0 : i32
    %c0_i32_1 = arith.constant 0 : i32
    return %c0_i32, %c0_i32_0 : i32, i32
  }
  func.func @transform_6(%arg0: i32) -> (i32, i32) {
    %c0_i32 = arith.constant 0 : i32
    %c0_i32_0 = arith.constant 0 : i32
    %c0_i32_1 = arith.constant 0 : i32
    return %c0_i32, %c0_i32_0 : i32, i32
  }
  func.func @transform_7(%arg0: i32) -> (i32, i32) {
    %c0_i32 = arith.constant 0 : i32
    %c0_i32_0 = arith.constant 0 : i32
    %c0_i32_1 = arith.constant 0 : i32
    return %c0_i32, %c0_i32_0 : i32, i32
  }
  func.func @transform_8(%arg0: i32) -> (i32, i32) {
    %c0_i32 = arith.constant 0 : i32
    %c0_i32_0 = arith.constant 0 : i32
    %c0_i32_1 = arith.constant 0 : i32
    return %c0_i32, %c0_i32_0 : i32, i32
  }
  func.func @transform_9(%arg0: i32) -> (i32, i32) {
    %c0_i32 = arith.constant 0 : i32
    %c0_i32_0 = arith.constant 0 : i32
    return %arg0, %c0_i32 : i32, i32
  }
  func.func @transform_10(%arg0: i32) -> (i32, i32) {
    %c0_i32 = arith.constant 0 : i32
    %c0_i32_0 = arith.constant 0 : i32
    return %arg0, %c0_i32 : i32, i32
  }
  func.func @transform_11(%arg0: i32) -> (i32, i32) {
    %c0_i32 = arith.constant 0 : i32
    %c0_i32_0 = arith.constant 0 : i32
    return %arg0, %c0_i32 : i32, i32
  }
}

</mosaic_0001>

<bundles_post_ra>
// kernel: tpu_custom_call.1
= control target key start
LH: loop header
LB: loop body
LE: loop exit
PB: predicated region body
PF: predicated region fallthrough
CT: control target
= control target key end

     0   :  { %17 = vsyncpa [#allocation3], 0  ;;  %s1984_s0 = inlined_call_operand.hbm [shape: bf16[8,1024], index: 0, kind: input, shape index: {}]   ;;  %s1985_s1 = inlined_call_operand.hbm [shape: bf16[1024,128], index: 1, kind: input, shape index: {}]   ;;  %s1986_s2 = inlined_call_operand.hbm [shape: f32[1,128], index: 2, kind: input, shape index: {}]   ;;  %s1987_s3 = inlined_call_operand.hbm [shape: bf16[128,128], index: 3, kind: input, shape index: {}]   ;;  %s1988_s4 = inlined_call_operand.hbm [shape: f32[1,128], index: 4, kind: input, shape index: {}]   ;;  %s1989_s5 = inlined_call_operand.hbm [shape: bf16[128,128], index: 5, kind: input, shape index: {}]   ;;  %s1990_s6 = inlined_call_operand.hbm [shape: f32[1,128], index: 6, kind: input, shape index: {}]   ;;  %s1991_s7 = inlined_call_operand.hbm [shape: bf16[128,128], index: 7, kind: input, shape index: {}]   ;;  %s1992_s8 = inlined_call_operand.hbm [shape: f32[1,128], index: 8, kind: input, shape index: {}]   ;;  %s1993_s9 = inlined_call_operand.vmem [shape: f32[8,128], index: 9, kind: input, shape index: {}]   ;;  %s1994_s10 = inlined_call_operand.hbm [shape: f32[8,128], index: 10, kind: output, shape index: {0}]   ;;  %s1995_s11 = inlined_call_operand.hbm [shape: f32[8,128], index: 11, kind: output, shape index: {1}]  }
   0x1   :  { %18 = vsyncpa [#allocation6], 0 }
   0x2   :  { %19 = vsyncpa [#allocation9], 0 }
   0x3   :  { %20 = vsyncpa [#allocation12], 0 }
   0x4   :  { %21 = vsyncpa [#allocation15], 0 }
   0x5   :  { %22 = vsyncpa [#allocation4], 0  ;;  %s39_s19 = sshll.u32 %s1985_s1, 4  ;;  %s40_s19 = int_to_ptr.hbm [resolvable:$true] %s39_s19 }
   0x6   :  { %23 = vsyncpa [#allocation19], 0  ;;  %s1875_s20 = smov [#allocation5]   ;;  %s63_s24 = sshll.u32 %s1987_s3, 4  ;;  %s64_s24 = int_to_ptr.hbm [resolvable:$true] %s63_s24 }
   0x7   :  { %s41_s21 = sshll.u32 %s1875_s20, 4  ;;  %s1876_s25 = smov 64   ;;  %s42_s21 = int_to_ptr.vmem [resolvable:$true] %s41_s21 }
   0x8   :  { %s1877_s26 = smov 4   ;;  %s1878_s27 = smov [#allocation8]  }
   0x9   :  { %47 = dma.hbm_to_vmem [thread:$0]  %s40_s19, 8192, %s42_s21, [#allocation6], %s1876_s25, %s1876_s25, %s1877_s26  }
   0xa   :  { %s65_s28 = sshll.u32 %s1878_s27, 4  ;;  %s87_s12 = sshll.u32 %s1989_s5, 4  ;;  %s66_s28 = int_to_ptr.vmem [resolvable:$true] %s65_s28  ;;  %s88_s12 = int_to_ptr.hbm [resolvable:$true] %s87_s12 }
   0xb   :  { %71 = dma.hbm_to_vmem [thread:$0]  %s64_s24, 1024, %s66_s28, [#allocation9], %s1876_s25, %s1876_s25, %s1877_s26  }
   0xc   :  { %s111_s14 = sshll.u32 %s1991_s7, 4  ;;  %s1879_s15 = smov [#allocation11]   ;;  %s112_s14 = int_to_ptr.hbm [resolvable:$true] %s111_s14 }
   0xd   :  { %s89_s16 = sshll.u32 %s1879_s15, 4  ;;  %s1880_s3 = smov [#allocation14]   ;;  %s90_s16 = int_to_ptr.vmem [resolvable:$true] %s89_s16 }
   0xe   :  { %95 = dma.hbm_to_vmem [thread:$0]  %s88_s12, 1024, %s90_s16, [#allocation12], %s1876_s25, %s1876_s25, %s1877_s26  }
   0xf   :  { %s113_s17 = sshll.u32 %s1880_s3, 4  ;;  %s29_s20 = sshll.u32 %s1984_s0, 4  ;;  %s114_s17 = int_to_ptr.vmem [resolvable:$true] %s113_s17  ;;  %s30_s20 = int_to_ptr.hbm [resolvable:$true] %s29_s20 }
  0x10   :  { %119 = dma.hbm_to_vmem [thread:$0]  %s112_s14, 1024, %s114_s17, [#allocation15], %s1876_s25, %s1876_s25, %s1877_s26  }
  0x11   :  { %s53_s22 = sshll.u32 %s1986_s2, 4  ;;  %s1881_s23 = smov [#allocation2]   ;;  %s54_s22 = int_to_ptr.hbm [resolvable:$true] %s53_s22 }
  0x12   :  { %s31_s7 = sshll.u32 %s1881_s23, 4  ;;  %s1882_s24 = smov [#allocation7]   ;;  %s32_s7 = int_to_ptr.vmem [resolvable:$true] %s31_s7 }
  0x13   :  { %34 = dma.hbm_to_vmem [thread:$0]  %s30_s20, 512, %s32_s7, [#allocation3]  }
  0x14   :  { %s55_s27 = sshll.u32 %s1882_s24, 4  ;;  %s77_s30 = sshll.u32 %s1988_s4, 4  ;;  %s56_s27 = int_to_ptr.vmem [resolvable:$true] %s55_s27  ;;  %s78_s30 = int_to_ptr.hbm [resolvable:$true] %s77_s30 }
  0x15   :  { %58 = dma.hbm_to_vmem [thread:$0]  %s54_s22, 16, %s56_s27, [#allocation6]  }
  0x16   :  { %s101_s26 = sshll.u32 %s1990_s6, 4  ;;  %s1883_s12 = smov [#allocation10]   ;;  %s102_s26 = int_to_ptr.hbm [resolvable:$true] %s101_s26 }
  0x17   :  { %s79_s2 = sshll.u32 %s1883_s12, 4  ;;  %s1884_s1 = smov [#allocation13]   ;;  %s80_s2 = int_to_ptr.vmem [resolvable:$true] %s79_s2 }
  0x18   :  { %82 = dma.hbm_to_vmem [thread:$0]  %s78_s30, 16, %s80_s2, [#allocation9]  }
  0x19   :  { %s103_s13 = sshll.u32 %s1884_s1, 4  ;;  %s125_s16 = sshll.u32 %s1992_s8, 4  ;;  %s104_s13 = int_to_ptr.vmem [resolvable:$true] %s103_s13  ;;  %s126_s16 = int_to_ptr.hbm [resolvable:$true] %s125_s16 }
  0x1a   :  { %106 = dma.hbm_to_vmem [thread:$0]  %s102_s26, 16, %s104_s13, [#allocation12]  }
  0x1b   :  { %s1885_s4 = smov [#allocation16]  }
  0x1c   :  { %s127_s3 = sshll.u32 %s1885_s4, 4  ;;  %s128_s3 = int_to_ptr.vmem [resolvable:$true] %s127_s3 }
  0x1d   :  { %130 = dma.hbm_to_vmem [thread:$0]  %s126_s16, 16, %s128_s3, [#allocation15]  }
  0x1e   :  { %1861 = dma.done.wait [#allocation3], 512  }
  0x1f   :  { %1862 = vsyncadd [#allocation3], 4294966784 }
  0x20   :  { %1863 = dma.done.wait [#allocation6], 8208  }
  0x21   :  { %1864 = vsyncadd [#allocation6], 4294959088 }
  0x22   :  { %1865 = dma.done.wait [#allocation9], 1040  }
  0x23   :  { %1866 = vsyncadd [#allocation9], 4294966256 }
  0x24   :  { %1867 = dma.done.wait [#allocation12], 1040  }
  0x25   :  { %1868 = vsyncadd [#allocation12], 4294966256 }
  0x26   :  { %1869 = dma.done.wait [#allocation15], 1040  }
  0x27   :  { %1870 = vsyncadd [#allocation15], 4294966256  ;;  %v1495_v0 = vld [vmem:[#allocation5 + $0x38] sm:$0xff]  ;;  %v1494_v4 = vld [vmem:[#allocation5 + $0x30] sm:$0xff]  ;;  %s1886_s17 = smov [#allocation18]   ;;  %s1116_s5 = sshll.u32 %s1995_s11, 4  ;;  %s1117_s5 = int_to_ptr.hbm [resolvable:$true] %s1116_s5 }
  0x28   :  { %v1503_v1 = vld [vmem:[#allocation5 + $0x78] sm:$0xff]  ;;  %717 = vmatpush.bf16.msra.mxu0 %v1495_v0  ;;  %v1502_v5 = vld [vmem:[#allocation5 + $0x70] sm:$0xff]  ;;  %v1493_v8 = vld [vmem:[#allocation5 + $0x28] sm:$0xff]  ;;  %s1114_s18 = sshll.u32 %s1886_s17, 4  ;;  %s1887_s21 = smov [#allocation17]   ;;  %s1115_s18 = int_to_ptr.vmem [resolvable:$true] %s1114_s18 }
  0x29   :  { %v1511_v2 = vld [vmem:[#allocation5 + $0xb8] sm:$0xff]  ;;  %730 = vmatpush.bf16.msra.mxu1 %v1503_v1  ;;  %v1510_v6 = vld [vmem:[#allocation5 + $0xb0] sm:$0xff]  ;;  %v1501_v9 = vld [vmem:[#allocation5 + $0x68] sm:$0xff]  ;;  %s1105_s7 = sshll.u32 %s1994_s10, 4  ;;  %s1106_s7 = int_to_ptr.hbm [resolvable:$true] %s1105_s7 }
  0x2a   :  { %v1519_v3 = vld [vmem:[#allocation5 + $0xf8] sm:$0xff]  ;;  %743 = vmatpush.bf16.msra.mxu2 %v1511_v2  ;;  %v1518_v7 = vld [vmem:[#allocation5 + $0xf0] sm:$0xff]  ;;  %v1509_v10 = vld [vmem:[#allocation5 + $0xa8] sm:$0xff] }
  0x2b   :  { %756 = vmatpush.bf16.msra.mxu3 %v1519_v3  ;;  %v1517_v11 = vld [vmem:[#allocation5 + $0xe8] sm:$0xff]  ;;  %v1492_v12 = vld [vmem:[#allocation5 + $0x20] sm:$0xff]  ;;  %v1491_v16 = vld [vmem:[#allocation5 + $0x18] sm:$0xff] }
  0x2c   :  { %718 = vmatpush.bf16.msra.mxu0 %v1494_v4  ;;  %v1500_v13 = vld [vmem:[#allocation5 + $0x60] sm:$0xff]  ;;  %v1499_v17 = vld [vmem:[#allocation5 + $0x58] sm:$0xff]  ;;  %v1490_v20 = vld [vmem:[#allocation5 + $0x10] sm:$0xff] }
  0x2d   :  { %731 = vmatpush.bf16.msra.mxu1 %v1502_v5  ;;  %v1508_v14 = vld [vmem:[#allocation5 + $0xa0] sm:$0xff]  ;;  %v1507_v18 = vld [vmem:[#allocation5 + $0x98] sm:$0xff]  ;;  %v1498_v21 = vld [vmem:[#allocation5 + $0x50] sm:$0xff] }
  0x2e   :  { %744 = vmatpush.bf16.msra.mxu2 %v1510_v6  ;;  %v1516_v15 = vld [vmem:[#allocation5 + $0xe0] sm:$0xff]  ;;  %v1515_v19 = vld [vmem:[#allocation5 + $0xd8] sm:$0xff]  ;;  %v1506_v22 = vld [vmem:[#allocation5 + $0x90] sm:$0xff] }
  0x2f   :  { %757 = vmatpush.bf16.msra.mxu3 %v1518_v7  ;;  %v1514_v23 = vld [vmem:[#allocation5 + $0xd0] sm:$0xff]  ;;  %v1489_v24 = vld [vmem:[#allocation5 + $0x8] sm:$0xff]  ;;  %v169_v29 = vld [vmem:[#allocation2] sm:$0xff] }
  0x30   :  { %719 = vmatpush.bf16.msra.mxu0 %v1493_v8  ;;  %v1497_v25 = vld [vmem:[#allocation5 + $0x48] sm:$0xff]  ;;  %v1488_v30 = vld [vmem:[#allocation5] sm:$0xff]  ;;  %v309_v33 = vunpack.c.l.b16 %v169_v29  ;;  %v310_v37 = vunpack.c.h.b16 %v169_v29  ;;  %v1527_v38 = vld [vmem:[#allocation5 + $0x138] sm:$0xff] }
  0x31   :  { %732 = vmatpush.bf16.msra.mxu1 %v1501_v9  ;;  %v1505_v26 = vld [vmem:[#allocation5 + $0x88] sm:$0xff]  ;;  %v1496_v31 = vld [vmem:[#allocation5 + $0x40] sm:$0xff]  ;;  %v1535_v39 = vld [vmem:[#allocation5 + $0x178] sm:$0xff] }
  0x32   :  { %745 = vmatpush.bf16.msra.mxu2 %v1509_v10  ;;  %v1513_v27 = vld [vmem:[#allocation5 + $0xc8] sm:$0xff]  ;;  %v1504_v34 = vld [vmem:[#allocation5 + $0x80] sm:$0xff]  ;;  %v1543_v40 = vld [vmem:[#allocation5 + $0x1b8] sm:$0xff]  ;;  %v317_v43 = vpack.c.b16 %v309_v33, %v309_v33  ;;  %v318_v45 = vpack.c.b16 %v310_v37, %v310_v37 }
  0x33   :  { %758 = vmatpush.bf16.msra.mxu3 %v1517_v11  ;;  %v170_v28 = vld [vmem:[#allocation2 + $0x8] sm:$0xff]  ;;  %v1512_v35 = vld [vmem:[#allocation5 + $0xc0] sm:$0xff]  ;;  %v1551_v41 = vld [vmem:[#allocation5 + $0x1f8] sm:$0xff] }
  0x34   :  { %720 = vmatpush.bf16.msra.mxu0 %v1492_v12  ;;  %v311_v32 = vunpack.c.l.b16 %v170_v28  ;;  %v312_v36 = vunpack.c.h.b16 %v170_v28  ;;  %v1526_v46 = vld [vmem:[#allocation5 + $0x130] sm:$0xff]  ;;  %v1525_v50 = vld [vmem:[#allocation5 + $0x128] sm:$0xff]  ;;  %v1524_v54 = vld [vmem:[#allocation5 + $0x120] sm:$0xff] }
  0x35   :  { %733 = vmatpush.bf16.msra.mxu1 %v1500_v13  ;;  %v1534_v47 = vld [vmem:[#allocation5 + $0x170] sm:$0xff]  ;;  %v1533_v51 = vld [vmem:[#allocation5 + $0x168] sm:$0xff]  ;;  %v1532_v55 = vld [vmem:[#allocation5 + $0x160] sm:$0xff] }
  0x36   :  { %746 = vmatpush.bf16.msra.mxu2 %v1508_v14  ;;  %v319_v42 = vpack.c.b16 %v311_v32, %v311_v32  ;;  %v320_v44 = vpack.c.b16 %v312_v36, %v312_v36  ;;  %v1542_v48 = vld [vmem:[#allocation5 + $0x1b0] sm:$0xff]  ;;  %v1541_v52 = vld [vmem:[#allocation5 + $0x1a8] sm:$0xff]  ;;  %v1540_v56 = vld [vmem:[#allocation5 + $0x1a0] sm:$0xff] }
  0x37   :  { %759 = vmatpush.bf16.msra.mxu3 %v1516_v15  ;;  %v1550_v49 = vld [vmem:[#allocation5 + $0x1f0] sm:$0xff]  ;;  %v1549_v53 = vld [vmem:[#allocation5 + $0x1e8] sm:$0xff]  ;;  %v1548_v57 = vld [vmem:[#allocation5 + $0x1e0] sm:$0xff] }
  0x38   :  { %721 = vmatpush.bf16.msra.mxu0 %v1491_v16  ;;  %v1523_v58 = vld [vmem:[#allocation5 + $0x118] sm:$0xff]  ;;  %v1522_v62 = vld [vmem:[#allocation5 + $0x110] sm:$0xff]  ;;  %v1521_v2 = vld [vmem:[#allocation5 + $0x108] sm:$0xff] }
  0x39   :  { %734 = vmatpush.bf16.msra.mxu1 %v1499_v17  ;;  %v1531_v59 = vld [vmem:[#allocation5 + $0x158] sm:$0xff]  ;;  %v1530_v63 = vld [vmem:[#allocation5 + $0x150] sm:$0xff]  ;;  %v1529_v3 = vld [vmem:[#allocation5 + $0x148] sm:$0xff] }
  0x3a   :  { %747 = vmatpush.bf16.msra.mxu2 %v1507_v18  ;;  %v1539_v60 = vld [vmem:[#allocation5 + $0x198] sm:$0xff]  ;;  %v1538_v0 = vld [vmem:[#allocation5 + $0x190] sm:$0xff]  ;;  %v1537_v5 = vld [vmem:[#allocation5 + $0x188] sm:$0xff] }
  0x3b   :  { %760 = vmatpush.bf16.msra.mxu3 %v1515_v19  ;;  %v1547_v61 = vld [vmem:[#allocation5 + $0x1d8] sm:$0xff]  ;;  %v1546_v1 = vld [vmem:[#allocation5 + $0x1d0] sm:$0xff]  ;;  %v1545_v6 = vld [vmem:[#allocation5 + $0x1c8] sm:$0xff] }
  0x3c   :  { %722 = vmatpush.bf16.msra.mxu0 %v1490_v20  ;;  %v171_v4 = vld [vmem:[#allocation2 + $0x10] sm:$0xff]  ;;  %v172_v7 = vld [vmem:[#allocation2 + $0x18] sm:$0xff]  ;;  %v1520_v10 = vld [vmem:[#allocation5 + $0x100] sm:$0xff] }
  0x3d   :  { %735 = vmatpush.bf16.msra.mxu1 %v1498_v21  ;;  %v313_v8 = vunpack.c.l.b16 %v171_v4  ;;  %v314_v9 = vunpack.c.h.b16 %v171_v4  ;;  %v1528_v11 = vld [vmem:[#allocation5 + $0x140] sm:$0xff]  ;;  %v315_v12 = vunpack.c.l.b16 %v172_v7  ;;  %v316_v13 = vunpack.c.h.b16 %v172_v7  ;;  %v1558_v21 = vld [vmem:[#allocation8 + $0x30] sm:$0xff]  ;;  %v1553_v28 = vld [vmem:[#allocation8 + $0x8] sm:$0xff] }
  0x3e   :  { %748 = vmatpush.bf16.msra.mxu2 %v1506_v22  ;;  %v1536_v14 = vld [vmem:[#allocation5 + $0x180] sm:$0xff]  ;;  %v1557_v22 = vld [vmem:[#allocation8 + $0x28] sm:$0xff] }
  0x3f   :  { %761 = vmatpush.bf16.msra.mxu3 %v1514_v23  ;;  %v1544_v15 = vld [vmem:[#allocation5 + $0x1c0] sm:$0xff]  ;;  %v321_v16 = vpack.c.b16 %v313_v8, %v313_v8  ;;  %v322_v17 = vpack.c.b16 %v314_v9, %v314_v9  ;;  %v323_v18 = vpack.c.b16 %v315_v12, %v315_v12  ;;  %v324_v19 = vpack.c.b16 %v316_v13, %v316_v13  ;;  %v1573_v7 = vld [vmem:[#allocation14 + $0x28] sm:$0xff] }
  0x40   :  { %723 = vmatpush.bf16.msra.mxu0 %v1489_v24  ;;  %v1559_v20 = vld [vmem:[#allocation8 + $0x38] sm:$0xff]  ;;  %v1556_v23 = vld [vmem:[#allocation8 + $0x20] sm:$0xff]  ;;  %v1569_v12 = vld [vmem:[#allocation14 + $0x8] sm:$0xff] }
  0x41   :  { %736 = vmatpush.bf16.msra.mxu1 %v1497_v25  ;;  %v1555_v24 = vld [vmem:[#allocation8 + $0x18] sm:$0xff]  ;;  %v1552_v32 = vld [vmem:[#allocation8] sm:$0xff] }
  0x42   :  { %749 = vmatpush.bf16.msra.mxu2 %v1505_v26  ;;  %v1554_v26 = vld [vmem:[#allocation8 + $0x10] sm:$0xff]  ;;  %v1572_v8 = vld [vmem:[#allocation14 + $0x20] sm:$0xff]  ;;  %v1571_v9 = vld [vmem:[#allocation14 + $0x18] sm:$0xff] }
  0x43   :  { %762 = vmatpush.bf16.msra.mxu3 %v1513_v27 }
  0x44   :  { %724 = vmatpush.bf16.msra.mxu0 %v1488_v30 }
  0x45   :  { %737 = vmatpush.bf16.msra.mxu1 %v1496_v31 }
  0x46   :  { %750 = vmatpush.bf16.msra.mxu2 %v1504_v34  ;;  %v1589_v34 = vld [vmem:[#allocation7] ss:$0 sm:$0xff] }
  0x47   :  { %763 = vmatpush.bf16.msra.mxu3 %v1512_v35  ;;  %725 = vmatmul.bf16.vlgmr.msra.gmra.mxu0 %v317_v43  ;;  %v1567_v35 = vld [vmem:[#allocation11 + $0x38] sm:$0xff] }
  0x48   :  { %769 = vmatpush.bf16.msrb.mxu0 %v1527_v38  ;;  %738 = vmatmul.bf16.vlgmr.msra.gmra.mxu1 %v318_v45  ;;  %v1566_v38 = vld [vmem:[#allocation11 + $0x30] sm:$0xff] }
  0x49   :  { %782 = vmatpush.bf16.msrb.mxu1 %v1535_v39  ;;  %751 = vmatmul.bf16.vlgmr.msra.gmra.mxu2 %v319_v42  ;;  %v1564_v42 = vld [vmem:[#allocation11 + $0x20] sm:$0xff] }
  0x4a   :  { %795 = vmatpush.bf16.msrb.mxu2 %v1543_v40  ;;  %764 = vmatmul.bf16.vlgmr.msra.gmra.mxu3 %v320_v44  ;;  %v1565_v40 = vld [vmem:[#allocation11 + $0x28] sm:$0xff]  ;;  %v1563_v44 = vld [vmem:[#allocation11 + $0x18] sm:$0xff] }
  0x4b   :  { %808 = vmatpush.bf16.msrb.mxu3 %v1551_v41 }
  0x4c   :  { %770 = vmatpush.bf16.msrb.mxu0 %v1526_v46 }
  0x4d   :  { %783 = vmatpush.bf16.msrb.mxu1 %v1534_v47 }
  0x4e   :  { %796 = vmatpush.bf16.msrb.mxu2 %v1542_v48 }
  0x4f   :  { %809 = vmatpush.bf16.msrb.mxu3 %v1550_v49  ;;  %v1562_v49 = vld [vmem:[#allocation11 + $0x10] sm:$0xff] }
  0x50   :  { %771 = vmatpush.bf16.msrb.mxu0 %v1525_v50 }
  0x51   :  { %784 = vmatpush.bf16.msrb.mxu1 %v1533_v51 }
  0x52   :  { %797 = vmatpush.bf16.msrb.mxu2 %v1541_v52 }
  0x53   :  { %810 = vmatpush.bf16.msrb.mxu3 %v1549_v53 }
  0x54   :  { %772 = vmatpush.bf16.msrb.mxu0 %v1524_v54 }
  0x55   :  { %785 = vmatpush.bf16.msrb.mxu1 %v1532_v55 }
  0x56   :  { %798 = vmatpush.bf16.msrb.mxu2 %v1540_v56 }
  0x57   :  { %811 = vmatpush.bf16.msrb.mxu3 %v1548_v57 }
  0x58   :  { %773 = vmatpush.bf16.msrb.mxu0 %v1523_v58 }
  0x59   :  { %786 = vmatpush.bf16.msrb.mxu1 %v1531_v59 }
  0x5a   :  { %799 = vmatpush.bf16.msrb.mxu2 %v1539_v60 }
  0x5b   :  { %812 = vmatpush.bf16.msrb.mxu3 %v1547_v61  ;;  %v1561_v61 = vld [vmem:[#allocation11 + $0x8] sm:$0xff] }
  0x5c   :  { %774 = vmatpush.bf16.msrb.mxu0 %v1522_v62  ;;  %v1560_v62 = vld [vmem:[#allocation11] sm:$0xff] }
  0x5d   :  { %787 = vmatpush.bf16.msrb.mxu1 %v1530_v63  ;;  %v1590_v63 = vld [vmem:[#allocation10] ss:$0 sm:$0xff] }
  0x5e   :  { %800 = vmatpush.bf16.msrb.mxu2 %v1538_v0 }
  0x5f   :  { %813 = vmatpush.bf16.msrb.mxu3 %v1546_v1 }
  0x60   :  { %775 = vmatpush.bf16.msrb.mxu0 %v1521_v2 }
  0x61   :  { %788 = vmatpush.bf16.msrb.mxu1 %v1529_v3 }
  0x62   :  { %801 = vmatpush.bf16.msrb.mxu2 %v1537_v5  ;;  %v1575_v5 = vld [vmem:[#allocation14 + $0x38] sm:$0xff] }
  0x63   :  { %814 = vmatpush.bf16.msrb.mxu3 %v1545_v6  ;;  %v1574_v6 = vld [vmem:[#allocation14 + $0x30] sm:$0xff] }
  0x64   :  { %776 = vmatpush.bf16.msrb.mxu0 %v1520_v10  ;;  %v1570_v10 = vld [vmem:[#allocation14 + $0x10] sm:$0xff] }
  0x65   :  { %789 = vmatpush.bf16.msrb.mxu1 %v1528_v11  ;;  %v1591_v11 = vld [vmem:[#allocation13] ss:$0 sm:$0xff] }
  0x66   :  { %802 = vmatpush.bf16.msrb.mxu2 %v1536_v14 }
  0x67   :  { %815 = vmatpush.bf16.msrb.mxu3 %v1544_v15  ;;  %777 = vmatmul.bf16.vlgmr.msrb.gmra.mxu0 %v321_v16  ;;  %v1568_v15 = vld [vmem:[#allocation14] sm:$0xff] }
  0x68   :  { %790 = vmatmul.bf16.vlgmr.msrb.gmra.mxu1 %v322_v17  ;;  %891 = vmatpush.bf16.msra.mxu0 %v1559_v20 }
  0x69   :  { %803 = vmatmul.bf16.vlgmr.msrb.gmra.mxu2 %v323_v18  ;;  %974 = vmatpush.bf16.msra.mxu1 %v1567_v35 }
  0x6a   :  { %816 = vmatmul.bf16.vlgmr.msrb.gmra.mxu3 %v324_v19  ;;  %1084 = vmatpush.bf16.msra.mxu2 %v1575_v5 }
  0x6c   :  { %892 = vmatpush.bf16.msra.mxu0 %v1558_v21 }
  0x6d   :  { %975 = vmatpush.bf16.msra.mxu1 %v1566_v38 }
  0x6e   :  { %1085 = vmatpush.bf16.msra.mxu2 %v1574_v6 }
  0x70   :  { %893 = vmatpush.bf16.msra.mxu0 %v1557_v22  ;;  %v987_v22 = vlaneseq }
  0x71   :  { %976 = vmatpush.bf16.msra.mxu1 %v1565_v40  ;;  %v1592_v40 = vld [vmem:[#allocation16] ss:$0 sm:$0xff] }
  0x72   :  { %1086 = vmatpush.bf16.msra.mxu2 %v1573_v7 }
  0x74   :  { %894 = vmatpush.bf16.msra.mxu0 %v1556_v23 }
  0x75   :  { %977 = vmatpush.bf16.msra.mxu1 %v1564_v42 }
  0x76   :  { %1087 = vmatpush.bf16.msra.mxu2 %v1572_v8 }
  0x78   :  { %895 = vmatpush.bf16.msra.mxu0 %v1555_v24 }
  0x79   :  { %978 = vmatpush.bf16.msra.mxu1 %v1563_v44 }
  0x7a   :  { %1088 = vmatpush.bf16.msra.mxu2 %v1571_v9 }
  0x7c   :  { %896 = vmatpush.bf16.msra.mxu0 %v1554_v26 }
  0x7d   :  { %979 = vmatpush.bf16.msra.mxu1 %v1562_v49 }
  0x7e   :  { %1089 = vmatpush.bf16.msra.mxu2 %v1570_v10 }
  0x80   :  { %897 = vmatpush.bf16.msra.mxu0 %v1553_v28 }
  0x81   :  { %980 = vmatpush.bf16.msra.mxu1 %v1561_v61 }
  0x82   :  { %1090 = vmatpush.bf16.msra.mxu2 %v1569_v12 }
  0x84   :  { %898 = vmatpush.bf16.msra.mxu0 %v1552_v32 }
  0x85   :  { %981 = vmatpush.bf16.msra.mxu1 %v1560_v62 }
  0x86   :  { %1091 = vmatpush.bf16.msra.mxu2 %v1568_v15 }
  0xc4   :  { %v726_v25 = vpop.f32.mrf.mxu0 }
  0xc5   :  { %v739_v27 = vpop.f32.mrf.mxu1  ;;  %v727_v39 = vadd.f32 %v1589_v34, %v726_v25  ;;  %v988_v25 = vand.u32 127, %v987_v22  ;;  %v1011_v34 = vld [vmem:[%s1993_s9] sm:$0xff]  ;;  %s1103_s9 = sshll.u32 %s1887_s21, 4  ;;  %s1104_s9 = int_to_ptr.vmem [resolvable:$true] %s1103_s9 }
  0xc7   :  { %v740_v41 = vadd.f32 %v739_v27, %v727_v39  ;;  %vm990_vm0 = vcmp.ge.s32.totalorder %v988_v25, 32  ;;  %vm991_vm1 = vcmp.lt.s32.totalorder %v988_v25, 64  ;;  %vm989_vm4 = vcmp.lt.s32.totalorder %v988_v25, 32 }
  0xc8   :  { %vm992_vm3 = vmand %vm990_vm0, %vm991_vm1 }
  0xcc   :  { %v752_v29 = vpop.f32.mrf.mxu2  ;;  %v728_v31 = vpop.f32.mrf.mxu0 }
  0xcd   :  { %v765_v30 = vpop.f32.mrf.mxu3  ;;  %v741_v33 = vpop.f32.mrf.mxu1  ;;  %v753_v43 = vadd.f32 %v752_v29, %v740_v41 }
  0xcf   :  { %v766_v45 = vadd.f32 %v765_v30, %v753_v43 }
  0xd4   :  { %v754_v36 = vpop.f32.mrf.mxu2 }
  0xd5   :  { %v767_v37 = vpop.f32.mrf.mxu3 }
  0xe4   :  { %v778_v46 = vpop.f32.mrf.mxu0 }
  0xe5   :  { %v791_v47 = vpop.f32.mrf.mxu1  ;;  %v779_v48 = vadd.f32 %v778_v46, %v766_v45 }
  0xe7   :  { %v792_v50 = vadd.f32 %v791_v47, %v779_v48 }
  0xec   :  { %v804_v51 = vpop.f32.mrf.mxu2  ;;  %v780_v54 = vpop.f32.mrf.mxu0 }
  0xed   :  { %v817_v52 = vpop.f32.mrf.mxu3  ;;  %v805_v53 = vadd.f32 %v804_v51, %v792_v50  ;;  %v793_v55 = vpop.f32.mrf.mxu1 }
  0xef   :  { %v818_v56 = vadd.f32 %v817_v52, %v805_v53 }
  0xf1   :  { %v821_v57 = vmax.f32 %v818_v56, 0.0 }
  0xf3   :  { %v822_v58 = vpack.c.bf16 %v821_v57, %v821_v57 }
  0xf4   :  { %v806_v59 = vpop.f32.mrf.mxu2 }
  0xf5   :  { %v819_v60 = vpop.f32.mrf.mxu3  ;;  %899 = vmatmul.bf16.vlgmr.msra.gmra.mxu0 %v822_v58 }
 0x172   :  { %v900_v0 = vpop.f32.mrf.mxu0 }
 0x173   :  { %v901_v1 = vadd.f32 %v1590_v63, %v900_v0 }
 0x175   :  { %v904_v2 = vmax.f32 %v901_v1, 0.0 }
 0x177   :  { %v905_v3 = vpack.c.bf16 %v904_v2, %v904_v2 }
 0x179   :  { %982 = vmatmul.bf16.vlgmr.msra.gmra.mxu1 %v905_v3 }
 0x17a   :  { %v902_v4 = vpop.f32.mrf.mxu0 }
 0x1f6   :  { %v983_v13 = vpop.f32.mrf.mxu1 }
 0x1f7   :  { %v984_v14 = vadd.f32 %v1591_v11, %v983_v13 }
 0x1f9   :  { %v1455_v16 = vadd.f32 -5.0, %v984_v14 }
 0x1fb   :  { %v995_v17 = vand.u32 2147483647, %v1455_v16  ;;  %v994_v31 = vmax.f32 %v1455_v16, 0.0 }
 0x1fd   :  { %v996_v18 = vsub.f32 0.0, %v995_v17 }
 0x1fe   :  { %v985_v19 = vpop.f32.mrf.mxu1 }
 0x1ff   :  { %v997_v20 = vmul.f32 1.442695, %v996_v18 }
 0x201   :  { %1593 = vpow2.f32 %v997_v20 }
 0x207   :  { %v1594_v21 = vpop.eup %1593 }
 0x208   :  { %v999_v23 = vadd.f32 1.0, %v1594_v21  ;;  %v1002_v24 = vmul.f32 -0.5, %v1594_v21  ;;  %v1005_v27 = vand.u32 2147483647, %v1594_v21 }
 0x20a   :  { %1595 = vlog2.f32 %v999_v23  ;;  %v1003_v26 = vadd.f32 1.0, %v1002_v24  ;;  %vm1006_vm2 = vcmp.lt.f32.partialorder %v1005_v27, 0.0004427343 }
 0x20c   :  { %v1004_v30 = vmul.f32 %v1594_v21, %v1003_v26 }
 0x210   :  { %v1596_v28 = vpop.eup %1595 }
 0x211   :  { %v1001_v29 = vmul.f32 0.6931472, %v1596_v28 }
 0x213   :  { %v1007_v32 = vsel %vm1006_vm2, %v1004_v30, %v1001_v29 }
 0x214   :  { %v1008_v33 = vadd.f32 %v1007_v32, %v994_v31 }
 0x216   :  { %v1009_v35 = vsel %vm992_vm3, %v1008_v33, %v984_v14 }
 0x217   :  { %v1012_v36 = vmul.f32 %v1011_v34, %v1009_v35  ;;  %1010 = vst [vmem:[#allocation18] sm:$0xff] %v1009_v35 }
 0x218   :  { %1119 = dma.vmem_to_hbm [thread:$0]  %s1115_s18, 128, %s1117_s5, [#allocation19]  }
 0x219   :  { %v1013_v37 = vsel %vm992_vm3, %v1012_v36, 0.0 }
 0x21a   :  { %v1014_v38 = vsel %vm989_vm4, %v1009_v35, %v1013_v37 }
 0x21b   :  { %v1015_v39 = vpack.c.bf16 %v1014_v38, %v1014_v38 }
 0x21d   :  { %1092 = vmatmul.bf16.vlgmr.msra.gmra.mxu2 %v1015_v39 }
 0x2a0   :  { %v1093_v41 = vpop.f32.mrf.mxu2 }
 0x2a1   :  { %v1094_v42 = vadd.f32 %v1592_v40, %v1093_v41 }
 0x2a3   :  { %1097 = vst [vmem:[#allocation17] sm:$0xff] %v1094_v42 }
 0x2a4   :  { %1108 = dma.vmem_to_hbm [thread:$0]  %s1104_s9, 128, %s1106_s7, [#allocation4]  }
 0x2a8   :  { %v1095_v43 = vpop.f32.mrf.mxu2 }
 0x2a9   :  { %1871 = dma.done.wait [#allocation4], 128  }
 0x2aa   :  { %1872 = vsyncadd [#allocation4], 4294967168 }
 0x2ab   :  { %1873 = dma.done.wait [#allocation19], 128  }
 0x2ac   :  { %1874 = vsyncadd [#allocation19], 4294967168 }
 0x2ad   :  { %1128 = vsyncpa [#allocation3], 1 }
 0x2ae   :  { %1129 = vsyncpa [#allocation6], 1 }
 0x2af   :  { %1130 = vsyncpa [#allocation9], 1 }
 0x2b0   :  { %1131 = vsyncpa [#allocation12], 1 }
 0x2b1   :  { %1132 = vsyncpa [#allocation15], 1 }
 0x2b2   :  { %1133 = vsyncpa [#allocation4], 1 }
 0x2b3   :  { %1134 = vsyncpa [#allocation19], 1 }

</bundles_post_ra>
